<compile_context>
chip_gen: v7x
topology: tpu7x:2x2x1
jax: 0.10.0
libtpu: 0.0.40
codegen_flags: <defaults>
</compile_context>

<pallas_src>
import functools

import jax
import jax.numpy as jnp
from jax.experimental import pallas as pl
from jax.experimental.pallas import tpu as pltpu


def _se_kernel(x_ref, w1t_ref, b1_ref, w2t_ref, b2_ref, o_ref, *, inv_hw):
    # x_ref : (Nb, C, HW)    w1t_ref: (C, mid)   b1_ref: (1, mid)
    # w2t_ref: (mid, C)      b2_ref : (1, C)     o_ref : (Nb, C, HW)

    # Pass 1 over the VMEM slab: AdaptiveAvgPool2d(1) == mean over spatial.
    pool = jnp.sum(x_ref[...], axis=-1) * inv_hw              # (Nb, C) f32

    # 1x1 conv C -> mid, ReLU   (tiny MXU dot, f32)
    h = jnp.dot(pool, w1t_ref[...],
                preferred_element_type=jnp.float32,
                precision=jax.lax.Precision.HIGHEST)
    h = jnp.maximum(h + b1_ref[...], 0.0)                     # (Nb, mid)

    # 1x1 conv mid -> C, Sigmoid
    s = jnp.dot(h, w2t_ref[...],
                preferred_element_type=jnp.float32,
                precision=jax.lax.Precision.HIGHEST)
    s = jax.nn.sigmoid(s + b2_ref[...])                       # (Nb, C)

    # Pass 2 over the slab: scale (broadcast over spatial) and store lane-dense.
    o_ref[...] = x_ref[...] * s[:, :, None]


def _tpu_vmem_capacity_bytes():
    """Physical VMEM per TensorCore; conservative (v7x = 64 MiB) if the query fails."""
    try:
        info = pltpu.get_tpu_info()
        cap = int(getattr(info, "vmem_capacity_bytes", 0) or 0)
        if cap > 0:
            return cap
    except Exception:
        pass
    return 64 << 20


def _choose_block_batch(n, per_sample_bytes, budget_bytes, two_tensorcores):
    """Samples per grid step: largest divisor of N fitting the slab budget; on 2-TC chips
    prefer an even (balanced) step count as long as it doesn't shrink the slab >2x."""
    cap = max(1, budget_bytes // max(per_sample_bytes, 1))
    divisors = [d for d in range(1, n + 1) if n % d == 0]
    fitting = [d for d in divisors if d <= cap] or [1]
    nb = max(fitting)
    if two_tensorcores and n >= 2:
        even = [d for d in fitting if (n // d) % 2 == 0]       # even => >= 2 steps too
        if even and max(even) * 2 >= nb:
            nb = max(even)
        elif n // nb < 2:
            halves = [d for d in fitting if n // d >= 2]
            if halves:
                nb = max(halves)
    return max(nb, 1)


def se_module(x, w1, b1, w2, b2):
    """x: (N, C, H, W) float32; w1: (mid, C); b1: (mid,); w2: (C, mid); b2: (C,)."""
    N, C, H, W = x.shape
    mid = w1.shape[0]
    HW = H * W
    itemsize = jnp.dtype(x.dtype).itemsize

    # No padding / post-slice: the x/out block's last two dims equal the full array dims.
    x3 = x.reshape(N, C, HW)

    # Pre-transpose weights so both FCs are plain row-major MXU dots in-kernel.
    w1t = jnp.transpose(w1)                      # (C, mid)
    w2t = jnp.transpose(w2)                      # (mid, C)
    b1r = b1.reshape(1, mid)
    b2r = b2.reshape(1, C)

    # ---- generation-aware sizing ----------------------------------------------------
    vmem_cap = _tpu_vmem_capacity_bytes()
    two_tensorcores = vmem_cap <= (72 << 20)     # v7x-class: 64 MiB/TC, 2 TCs; else 128 MiB, 1 TC
    if two_tensorcores:
        vmem_ceiling = 56 << 20                  # leave Mosaic internal-scratch headroom in 64 MiB
    else:
        vmem_ceiling = min(vmem_cap - (24 << 20), 104 << 20)

    weight_bytes = (2 * C * mid + C + mid) * 4
    slack = 2 << 20
    per_sample_bytes = C * HW * itemsize

    # Per-step slab budget: big enough to hide the ~0.35 us/step overhead, small enough
    # that double-buffered in+out slabs (4x block) + resident weights fit under the ceiling.
    target = (12 << 20) if two_tensorcores else (16 << 20)
    max_block = max((vmem_ceiling - 2 * weight_bytes - slack) // 4, per_sample_bytes)
    budget = min(target, max_block)

    Nb = _choose_block_batch(N, per_sample_bytes, budget, two_tensorcores)
    grid = (N // Nb,)

    block_bytes = Nb * per_sample_bytes
    needed = 4 * block_bytes + 2 * weight_bytes + slack
    vmem_limit = int(min(max(needed, 32 << 20), vmem_ceiling))

    cost = pl.CostEstimate(
        flops=int(2 * N * C * HW + 4 * N * C * mid),
        transcendentals=int(N * C),
        bytes_accessed=int(2 * N * C * HW * itemsize + weight_bytes),
    )

    kernel = functools.partial(_se_kernel, inv_hw=1.0 / HW)

    # Weights/biases: constant index_map -> fetched once; single-buffer them to save VMEM.
    def _wspec(shape):
        return pl.BlockSpec(shape, lambda n: (0, 0), pipeline_mode=pl.Buffered(1))

    out3 = pl.pallas_call(
        kernel,
        out_shape=jax.ShapeDtypeStruct((N, C, HW), x.dtype),
        grid_spec=pltpu.PrefetchScalarGridSpec(
            num_scalar_prefetch=0,
            grid=grid,
            in_specs=[
                pl.BlockSpec((Nb, C, HW), lambda n: (n, 0, 0)),
                _wspec((C, mid)),
                _wspec((1, mid)),
                _wspec((mid, C)),
                _wspec((1, C)),
            ],
            out_specs=pl.BlockSpec((Nb, C, HW), lambda n: (n, 0, 0)),
        ),
        compiler_params=pltpu.CompilerParams(
            dimension_semantics=("parallel",),
            vmem_limit_bytes=vmem_limit,
        ),
        cost_estimate=cost,
    )(x3, w1t, b1r, w2t, b2r)

    return out3.reshape(N, C, H, W)


def _reference(x, w1, b1, w2, b2):
    pool = jnp.mean(x, axis=(2, 3), keepdims=True)                        # (N,C,1,1)
    h = jnp.einsum("mc,nchw->nmhw", w1, pool) + b1[None, :, None, None]
    h = jnp.maximum(h, 0.0)
    s = jnp.einsum("cm,nmhw->nchw", w2, h) + b2[None, :, None, None]
    return x * jax.nn.sigmoid(s)


if __name__ == "__main__":
    N, C, H, W = 2, 4, 16, 16
    reduction = 4
    mid = max(C // reduction, 8)

    key = jax.random.PRNGKey(0)
    kx, k1, k2, k3, k4 = jax.random.split(key, 5)
    x = jax.random.normal(kx, (N, C, H, W), dtype=jnp.float32)
    # 1x1-conv weights collapse to matrices
    w1 = jax.random.normal(k1, (mid, C), dtype=jnp.float32) * 0.2
    b1 = jax.random.normal(k2, (mid,), dtype=jnp.float32) * 0.1
    w2 = jax.random.normal(k3, (C, mid), dtype=jnp.float32) * 0.2
    b2 = jax.random.normal(k4, (C,), dtype=jnp.float32) * 0.1

    out = se_module(x, w1, b1, w2, b2)
    jax.block_until_ready(out)

    ref = _reference(x, w1, b1, w2, b2)
    assert jnp.allclose(out, ref, atol=1e-5, rtol=1e-5), "mismatch vs reference"
    print("KERNEL_OK")
</pallas_src>

<mosaic_0001>
module attributes {stable_mosaic.version = 11 : i64} {
  func.func @_se_kernel(%arg0: i32, %arg1: memref<1x4x256xf32, #tpu.memory_space<vmem>>, %arg2: memref<4x8xf32, #tpu.memory_space<vmem>>, %arg3: memref<1x8xf32, #tpu.memory_space<vmem>>, %arg4: memref<8x4xf32, #tpu.memory_space<vmem>>, %arg5: memref<1x4xf32, #tpu.memory_space<vmem>>, %arg6: memref<1x4x256xf32, #tpu.memory_space<vmem>>) attributes {dimension_semantics = [#tpu.dimension_semantics<parallel>], iteration_bounds = array<i64: 2>, scalar_prefetch = 0 : i64, scratch_operands = 0 : i64, tpu.core_type = #tpu.core_type<tc>, window_params = [{transform_indices = @transform_0, window_bounds = array<i64: 1, 4, 256>}, {pipeline_mode = #tpu.pipeline_mode<synchronous>, transform_indices = @transform_1, window_bounds = array<i64: 4, 8>}, {pipeline_mode = #tpu.pipeline_mode<synchronous>, transform_indices = @transform_2, window_bounds = array<i64: 1, 8>}, {pipeline_mode = #tpu.pipeline_mode<synchronous>, transform_indices = @transform_3, window_bounds = array<i64: 8, 4>}, {pipeline_mode = #tpu.pipeline_mode<synchronous>, transform_indices = @transform_4, window_bounds = array<i64: 1, 4>}, {transform_indices = @transform_5, window_bounds = array<i64: 1, 4, 256>}]} {
    %c0 = arith.constant 0 : index
    %c0_0 = arith.constant 0 : index
    %c0_1 = arith.constant 0 : index
    %0 = vector.load %arg1[%c0, %c0_0, %c0_1] : memref<1x4x256xf32, #tpu.memory_space<vmem>>, vector<1x4x256xf32>
    %cst = arith.constant dense<0.000000e+00> : vector<1x4xf32>
    %1 = vector.multi_reduction <add>, %0, %cst [2] : vector<1x4x256xf32> to vector<1x4xf32>
    %cst_2 = arith.constant 3.906250e-03 : f32
    %2 = vector.broadcast %cst_2 : f32 to vector<1x4xf32>
    %3 = arith.mulf %1, %2 : vector<1x4xf32>
    %c0_3 = arith.constant 0 : index
    %c0_4 = arith.constant 0 : index
    %4 = vector.load %arg2[%c0_3, %c0_4] : memref<4x8xf32, #tpu.memory_space<vmem>>, vector<4x8xf32>
    %cst_5 = arith.constant dense<0.000000e+00> : vector<1x8xf32>
    %5 = tpu.matmul %3, %4, %cst_5 {dimension_numbers = #tpu.dot_dimension_numbers<[1], [0], [0], [1], [0, 0, 1, 1], [], []>, precision = #tpu.contract_precision<fp32>} : vector<1x4xf32>, vector<4x8xf32>, vector<1x8xf32> -> vector<1x8xf32>
    %c0_6 = arith.constant 0 : index
    %c0_7 = arith.constant 0 : index
    %6 = vector.load %arg3[%c0_6, %c0_7] : memref<1x8xf32, #tpu.memory_space<vmem>>, vector<1x8xf32>
    %7 = arith.addf %5, %6 : vector<1x8xf32>
    %cst_8 = arith.constant 0.000000e+00 : f32
    %8 = vector.broadcast %cst_8 : f32 to vector<1x8xf32>
    %9 = arith.maximumf %7, %8 : vector<1x8xf32>
    %c0_9 = arith.constant 0 : index
    %c0_10 = arith.constant 0 : index
    %10 = vector.load %arg4[%c0_9, %c0_10] : memref<8x4xf32, #tpu.memory_space<vmem>>, vector<8x4xf32>
    %cst_11 = arith.constant dense<0.000000e+00> : vector<1x4xf32>
    %11 = tpu.matmul %9, %10, %cst_11 {dimension_numbers = #tpu.dot_dimension_numbers<[1], [0], [0], [1], [0, 0, 1, 1], [], []>, precision = #tpu.contract_precision<fp32>} : vector<1x8xf32>, vector<8x4xf32>, vector<1x4xf32> -> vector<1x4xf32>
    %c0_12 = arith.constant 0 : index
    %c0_13 = arith.constant 0 : index
    %12 = vector.load %arg5[%c0_12, %c0_13] : memref<1x4xf32, #tpu.memory_space<vmem>>, vector<1x4xf32>
    %13 = arith.addf %11, %12 : vector<1x4xf32>
    %14 = arith.negf %13 : vector<1x4xf32>
    %15 = math.exp %14 : vector<1x4xf32>
    %cst_14 = arith.constant 1.000000e+00 : f32
    %16 = vector.broadcast %cst_14 : f32 to vector<1x4xf32>
    %17 = arith.addf %16, %15 : vector<1x4xf32>
    %18 = arith.divf %16, %17 : vector<1x4xf32>
    %c0_15 = arith.constant 0 : index
    %c0_16 = arith.constant 0 : index
    %c0_17 = arith.constant 0 : index
    %19 = vector.load %arg1[%c0_15, %c0_16, %c0_17] : memref<1x4x256xf32, #tpu.memory_space<vmem>>, vector<1x4x256xf32>
    %20 = vector.shape_cast %18 : vector<1x4xf32> to vector<1x4x1xf32>
    %21 = vector.broadcast %20 : vector<1x4x1xf32> to vector<1x4x256xf32>
    %22 = arith.mulf %19, %21 : vector<1x4x256xf32>
    %c0_18 = arith.constant 0 : index
    %c0_19 = arith.constant 0 : index
    %c0_20 = arith.constant 0 : index
    %23 = vector.load %arg6[%c0_18, %c0_19, %c0_20] : memref<1x4x256xf32, #tpu.memory_space<vmem>>, vector<1x4x256xf32>
    tpu.vector_store %arg6[%c0_18, %c0_19, %c0_20], %22 {strides = array<i32>} : memref<1x4x256xf32, #tpu.memory_space<vmem>>, vector<1x4x256xf32>,
    return
  }
  func.func @transform_0(%arg0: i32) -> (i32, i32, i32) {
    %c0_i32 = arith.constant 0 : i32
    %c0_i32_0 = arith.constant 0 : i32
    %c0_i32_1 = arith.constant 0 : i32
    return %arg0, %c0_i32, %c0_i32_0 : i32, i32, i32
  }
  func.func @transform_1(%arg0: i32) -> (i32, i32) {
    %c0_i32 = arith.constant 0 : i32
    %c0_i32_0 = arith.constant 0 : i32
    %c0_i32_1 = arith.constant 0 : i32
    return %c0_i32, %c0_i32_0 : i32, i32
  }
  func.func @transform_2(%arg0: i32) -> (i32, i32) {
    %c0_i32 = arith.constant 0 : i32
    %c0_i32_0 = arith.constant 0 : i32
    %c0_i32_1 = arith.constant 0 : i32
    return %c0_i32, %c0_i32_0 : i32, i32
  }
  func.func @transform_3(%arg0: i32) -> (i32, i32) {
    %c0_i32 = arith.constant 0 : i32
    %c0_i32_0 = arith.constant 0 : i32
    %c0_i32_1 = arith.constant 0 : i32
    return %c0_i32, %c0_i32_0 : i32, i32
  }
  func.func @transform_4(%arg0: i32) -> (i32, i32) {
    %c0_i32 = arith.constant 0 : i32
    %c0_i32_0 = arith.constant 0 : i32
    %c0_i32_1 = arith.constant 0 : i32
    return %c0_i32, %c0_i32_0 : i32, i32
  }
  func.func @transform_5(%arg0: i32) -> (i32, i32, i32) {
    %c0_i32 = arith.constant 0 : i32
    %c0_i32_0 = arith.constant 0 : i32
    %c0_i32_1 = arith.constant 0 : i32
    return %arg0, %c0_i32, %c0_i32_0 : i32, i32, i32
  }
}

</mosaic_0001>

<bundles_post_ra>
// kernel: tpu_custom_call.1
= control target key start
LH: loop header
LB: loop body
LE: loop exit
PB: predicated region body
PF: predicated region fallthrough
CT: control target
= control target key end

     0   :  { %10 = vsyncpa [#allocation3], 0  ;;  %s1809_s0 = inlined_call_operand.hbm [shape: f32[2,4,256], index: 0, kind: input, shape index: {}]   ;;  %s1810_s1 = inlined_call_operand.vmem [shape: f32[4,8], index: 1, kind: input, shape index: {}]   ;;  %s1811_s2 = inlined_call_operand.vmem [shape: f32[1,8], index: 2, kind: input, shape index: {}]   ;;  %s1812_s3 = inlined_call_operand.vmem [shape: f32[8,4], index: 3, kind: input, shape index: {}]   ;;  %s1813_s4 = inlined_call_operand.vmem [shape: f32[1,4], index: 4, kind: input, shape index: {}]   ;;  %s1814_s5 = inlined_call_operand.hbm [shape: f32[2,4,256], index: 5, kind: output, shape index: {}]  }
   0x1   :  { %12 = vsyncpa [#allocation3 + $0x1], 0 }
   0x2   :  { %13 = vsyncpa [#allocation4], 0 }
   0x3   :  { %15 = vsyncpa [#allocation4 + $0x1], 0  ;;  %s1585_s18 = smov 0   ;;  %s1587_s19 = smov 0  }
   0x4   :  { %s1589_s20 = smov 0   ;;  %s1591_s21 = smov 0  }
   0x5 LB: > { %s1606_s22 = sadd.s32 4294967295, %s1548_s21   ;;  %s1275_s23 = sadd.s32 4294967294, %s1548_s21   ;;  %s1548_s21 = sphi %s1591_s21, %s1829_s21   ;;  %s1544_s20 = sphi %s1589_s20, %s1828_s20   ;;  %s1540_s19 = sphi %s1587_s19, %s1827_s19   ;;  %s1536_s18 = sphi %s1585_s18, %s1826_s18  }
   0x6   : > { %s1610_s24 = sadd.s32 1, %s1548_s21   ;;  %s28_s25 = sadd.s32 1, %s1544_s20 }
   0x7   : > { %s25_s26 = ssub.s32 %s1548_s21, %s1610_s24  ;;  %p35_p0 = scmp.ne.s32.totalorder %s1544_s20, %s1540_s19 }
   0x8   : > { %p26_p1 = scmp.eq.s32.totalorder %s25_s26, 0  ;;  %p36_p2 = scmp.eq.s32.totalorder %s1548_s21, 0 }
   0x9   : > { %p41_p3 = scmp.ne.s32.totalorder %s1540_s19, %s1536_s18  ;;  %p42_p4 = scmp.eq.s32.totalorder %s1606_s22, 0 }
   0xa   : > { %s1622_s27 = scalar_select %p26_p1, %s1544_s20, %s28_s25  }
   0xb   : > { %p1624_p5 = por %p36_p2, %p35_p0  ;;  %p1628_p6 = por %p42_p4, %p41_p3 }
   0xc   : > { %p149_p7 = scmp.eq.s32.totalorder %s1606_s22, 1  ;;  %p155_p8 = scmp.eq.s32.totalorder %s1275_s23, 1 }
   0xd   : > { %p1410_p10 = scmp.lt.s32.totalorder %s1548_s21, 2  ;;  %s187_s7 = sand.u32 1, %s1544_s20  }
   0xe   : > { %p1635_p11 = por %p149_p7, %p35_p0  ;;  %p1639_p12 = por %p155_p8, %p41_p3 }
   0xf   : > { %s1290_s8 = sshll.u32 %s1548_s21, 7  ;;  %s1278_s9 = sshll.u32 %s187_s7, 3 }
  0x10   : > { %s1818_s30 = scalar_select %p1635_p11, 1, 0 }
  0x11   : > { %s1819_s6 = scalar_select %p1639_p12, 1, 0 }
  0x12   : > { %s1648_s12 = scalar_lea.hbm %s1809_s0, %s1290_s8  ;;  %s191_s13 = scalar_lea.vmem [#allocation2], %s1278_s9 }
  0x13   : > { %s199_s14 = sshll.u32 %s191_s13, 4  ;;  %p1652_p13 = pnand %p1410_p10, %p1624_p5  ;;  %s1656_s14 = int_to_ptr.vmem [resolvable:$true] %s199_s14 }
  0x14   : > { %s188_s16 = scalar_lea.sflag [#allocation3], %s187_s7  ;;  %s1452_s17 = scalar_lea.hbm %s1648_s12, 128 }
  0x15   : > { %p1453_p2 = scmp.ne.s32.totalorder %s1648_s12, %s1452_s17  ;;  %p1454_p3 = pneg %p1652_p13 }
  0x16   : > { %s1457_s26 = scalar_lea.hbm %s1809_s0, 256  ;;  %p1458_p5 = scmp.lt.u32.totalorder %s1648_s12, %s1809_s0 }
  0x17   : > { %p1455_p4 = pnand %p1454_p3, %p1453_p2  ;;  %p1459_p8 = scmp.lt.u32.totalorder %s1457_s26, %s1452_s17 }
  0x18   : > { %p1461_p9 = scmp.lt.u32.totalorder %s1452_s17, %s1648_s12 }
  0x19   : > { %p1456_p7 = pneg %p1455_p4  ;;  %p1460_p10 = por %p1459_p8, %p1458_p5 }
  0x1b   : > { %p1462_p0 = por %p1461_p9, %p1460_p10 }
  0x1d   : > { %p1463_p1 = pnand %p1462_p0, %p1456_p7 }
  0x1f   : > { %1466 = shalt.err (!%p1463_p1)
}
  0x20   : > { %s1467_s7 = scalar_lea.vmem %s1656_s14, 128  ;;  %s1550_s9 = smov [#allocation2]  }
  0x21   : > { %p1468_p2 = scmp.ne.s32.totalorder %s1656_s14, %s1467_s7  ;;  %s1472_s10 = sshll.u32 %s1550_s9, 4  ;;  %s1473_s10 = int_to_ptr.vmem [resolvable:$false] %s1472_s10 }
  0x22   : > { %s1474_s11 = scalar_lea.vmem %s1473_s10, 256  ;;  %p1475_p11 = scmp.lt.s32.totalorder %s1656_s14, %s1473_s10 }
  0x23   : > { %p1470_p4 = pnand %p1468_p2, %p1454_p3  ;;  %p1476_p5 = scmp.lt.s32.totalorder %s1474_s11, %s1467_s7 }
  0x25   : > { %p1471_p12 = pneg %p1470_p4  ;;  %p1477_p8 = por %p1476_p5, %p1475_p11 }
  0x27   : > { %p1478_p9 = pnand %p1477_p8, %p1471_p12 }
  0x29   : > { %1481 = shalt.err (!%p1478_p9)
}
  0x2a   : > { %1405 = dma.hbm_to_vmem [thread:$0]  (!%p1652_p13), %s1648_s12, 128, %s1656_s14, %s188_s16  }
  0x2b   : > { %p1821_p0 = scmp.lt.s32.totalorder %s1548_s21, 3  ;;  %p1822_p1 = scmp.ge.s32.totalorder %s1548_s21, 1 }
  0x2d   : > { %p205_p3 = pnand %p1822_p1, %p1821_p0 }
  0x2e   : > { %s1690_s13 = sand.u32 (!%p205_p3), 1, %s1540_s19  }
  0x2f   : > { %208 = sbr.rel (%p205_p3) target bundleno = 900 (0x384), region = 40  ;;  %s1282_s17 = sshll.u32 (!%p205_p3), %s1690_s13, 3 }
  0x30   : > { %s211_s23 = scalar_lea.sflag (!%p205_p3), [#allocation3], %s1690_s13  ;;  %s214_s15 = scalar_lea.vmem (!%p205_p3), [#allocation2], %s1282_s17 }
  0x36   : > { %1527 = dma.done.wait (%p1628_p6), %s211_s23, 128  }
  0x37   : > { %1529 = vsyncadd (%p1628_p6), %s211_s23, 4294967168  ;;  %vm245_vm0 = vcmask 1043456   ;;  %v1700_v0 = vld [vmem:[%s214_s15] sm:$0xff]  ;;  %v1551_v8 = vmov 0.0   ;;  %vm1552_vm1 = vmmov 0   ;;  %v255_v9 = vlaneseq  ;;  %s1291_s7 = sshll.u32 %s1606_s22, 7 }
  0x38   : > { %v243_v1 = vcombine.high %v1700_v0, %v1700_v0  ;;  %v246_v2 = vsel %vm245_vm0, %v1700_v0, 0.0  ;;  %v252_v5 = vld [vmem:[%s1810_s1] sm:$0xf]  ;;  %1316 = vmatprep.subr.mxu0 %v1551_v8  ;;  %1318 = vmatprep.mubr.msk.f32.mxu0 %vm1552_vm1, %v1551_v8  ;;  %vm261_vm2 = vcmask 31744   ;;  %vm716_vm3 = vcmask 64512   ;;  %s240_s9 = scalar_lea.vmem [#allocation5], %s1282_s17  ;;  %s1765_s15 = scalar_lea.hbm %s1814_s5, %s1291_s7 }
  0x39   : > { %v265_v6 = vsel %vm245_vm0, %v252_v5, 0  ;;  %1346 = vmatprep.subr.mxu1 %v1551_v8  ;;  %1348 = vmatprep.mubr.msk.f32.mxu1 %vm1552_vm1, %v1551_v8  ;;  %v256_v10 = vand.u32 127, %v255_v9  ;;  %v1715_v11 = vshrl.u32 %v255_v9, 7  ;;  %v714_v26 = vld [vmem:[%s1812_s3] sm:$0xff]  ;;  %v1553_v53 = vmov 839922192  }
  0x3a   : > { %v247_v3 = vsel %vm245_vm0, %v243_v1, 0.0  ;;  %v268_v7 = vand.u32 4294901760, %v265_v6  ;;  %v721_v27 = vand.u32 4294901760, %v714_v26  ;;  %v253_v28 = vld [vmem:[%s1811_s2] sm:$0x1]  ;;  %v1181_v54 = vunpack.c.l.s4 %v1553_v53  ;;  %s1205_s10 = sshll.u32 %s240_s9, 4  ;;  %s1767_s10 = int_to_ptr.vmem [resolvable:$true] %s1205_s10 }
  0x3b   : > { %v248_v4 = vadd.f32 %v247_v3, %v246_v2  ;;  %v259_v12 = vsub.s32 %v256_v10, %v1715_v11  ;;  %v715_v43 = vld [vmem:[%s1813_s4] sm:$0x1]  ;;  %v1174_v50 = vsub.s32 0, %v1715_v11  ;;  %s1191_s12 = scalar_lea.sflag [#allocation4], %s1690_s13  ;;  %s1482_s14 = scalar_lea.vmem %s1767_s10, 128 }
  0x3c   : > { %1317 = vmatpush3.msra.mxu0 %v268_v7  ;;  %v345_v14 = vsub.f32 %v265_v6, %v268_v7  ;;  %1347 = vmatpush3.msra.mxu1 %v721_v27  ;;  %v798_v32 = vsub.f32 %v714_v26, %v721_v27  ;;  %v1182_v55 = vunpack.c.0.s8 %v1181_v54  ;;  %p1483_p6 = scmp.ne.s32.totalorder %s1767_s10, %s1482_s14  ;;  %p1823_p11 = scmp.ne.s32.totalorder %s1818_s30, 0 }
  0x3d   : > { %249 = vadd.xlane.f32.xlu0 %v248_v4  ;;  %1321 = vmatprep.subr.mxu0 %v1551_v8  ;;  %s1554_s22 = smov [#allocation5]  }
  0x3e   : > { %v346_v18 = vand.u32 4294901760, %v345_v14  ;;  %1351 = vmatprep.subr.mxu1 %v1551_v8  ;;  %v799_v35 = vand.u32 4294901760, %v798_v32  ;;  %v1185_v56 = vsub.s32 %v1182_v55, %v1715_v11  ;;  %p1484_p12 = pnand %p1483_p6, %p1823_p11  ;;  %s1486_s17 = sshll.u32 %s1554_s22, 4  ;;  %s1487_s17 = int_to_ptr.vmem [resolvable:$false] %s1486_s17 }
  0x3f   : > { %s1488_s29 = scalar_lea.vmem %s1487_s17, 256  ;;  %p1489_p7 = scmp.lt.s32.totalorder %s1767_s10, %s1487_s17 }
  0x40   : > { %v347_v21 = vsub.f32 %v345_v14, %v346_v18  ;;  %v800_v38 = vsub.f32 %v798_v32, %v799_v35  ;;  %p1485_p13 = pneg %p1484_p12  ;;  %p1490_p10 = scmp.lt.s32.totalorder %s1488_s29, %s1482_s14 }
  0x42   : > { %v348_v24 = vand.u32 4294901760, %v347_v21  ;;  %v801_v41 = vand.u32 4294901760, %v800_v38  ;;  %p1491_p2 = por %p1490_p10, %p1489_p7 }
  0x44   : > { %p1492_p4 = pnand %p1491_p2, %p1485_p13 }
  0xca   : > { %v250_v13 = vpop.xlane.xlu0 %249 }
  0xcb   : > { %v251_v15 = vmul.f32 0.00390625, %v250_v13 }
  0xcd   : > { %v260_v16 = vrot.slane %v251_v15, %v259_v12 }
  0xcf   : > { %v262_v17 = vsel %vm261_vm2, %v260_v16, 0 }
  0xd0   : > { %v333_v19 = vand.u32 4294901760, %v262_v17 }
  0xd2   : > { %v334_v20 = vsub.f32 %v262_v17, %v333_v19 }
  0xd4   : > { %v335_v22 = vand.u32 4294901760, %v334_v20 }
  0xd6   : > { %v336_v23 = vsub.f32 %v334_v20, %v335_v22 }
  0xd8   : > { %v337_v25 = vand.u32 4294901760, %v336_v23 }
  0xda   : > { %1319 = vmatmul.mubr.f32.vlgmr.msra.gmra.mrb[0].mxu0 %v337_v25 }
  0xdb   : > { %1322 = vmatpush3.msra.mxu0 %v348_v24  ;;  %1323 = vmatprep.mubr.msk.f32.mxu0 %vm1552_vm1, %v1551_v8 }
  0xdc   : > { %1326 = vmatprep.subr.mxu0 %v1551_v8 }
  0xe2   : > { %1324 = vmatmul.mubr.f32.vlgmr.msra.gmra.mrb[0].mxu0 %v333_v19 }
  0xe3   : > { %1327 = vmatpush3.msra.mxu0 %v345_v14  ;;  %1328 = vmatprep.mubr.msk.f32.mxu0 %vm1552_vm1, %v1551_v8 }
  0xe4   : > { %1331 = vmatprep.subr.mxu0 %v1551_v8 }
  0xea   : > { %1329 = vmatmul.mubr.f32.vlgmr.msra.gmra.mrb[0].mxu0 %v334_v20 }
  0xeb   : > { %1332 = vmatpush3.msra.mxu0 %v268_v7  ;;  %1333 = vmatprep.mubr.msk.f32.mxu0 %vm1552_vm1, %v1551_v8 }
  0xec   : > { %1336 = vmatprep.subr.mxu0 %v1551_v8 }
  0xf2   : > { %1334 = vmatmul.mubr.f32.vlgmr.msra.gmra.mrb[0].mxu0 %v335_v22 }
  0xf3   : > { %1337 = vmatpush3.msra.mxu0 %v346_v18  ;;  %1338 = vmatprep.mubr.msk.f32.mxu0 %vm1552_vm1, %v1551_v8 }
  0xf4   : > { %1341 = vmatprep.subr.mxu0 %v1551_v8 }
  0xfa   : > { %1339 = vmatmul.mubr.f32.vlgmr.msra.gmra.mrb[0].mxu0 %v333_v19 }
  0xfb   : > { %1342 = vmatpush3.msra.mxu0 %v268_v7  ;;  %1343 = vmatprep.mubr.msk.f32.mxu0 %vm1552_vm1, %v1551_v8 }
 0x102   : > { %1344 = vmatmul.mubr.f32.vlgmr.msra.gmra.mrb[0].mxu0 %v333_v19 }
 0x1d5   : > { %v709_v29 = vpop.f32.mrb[0].mxu0 }
 0x1d6   : > { %v1376_v30 = vadd.f32 %v709_v29, %v253_v28  ;;  %v1345_v31 = vpop.f32.mrb[1].mxu0 }
 0x1d8   : > { %v713_v33 = vmax.f32 %v1376_v30, 0.0 }
 0x1da   : > { %v718_v34 = vsel %vm716_vm3, %v713_v33, 0 }
 0x1db   : > { %v786_v36 = vand.u32 4294901760, %v718_v34 }
 0x1dd   : > { %v787_v37 = vsub.f32 %v718_v34, %v786_v36 }
 0x1df   : > { %v788_v39 = vand.u32 4294901760, %v787_v37 }
 0x1e1   : > { %v789_v40 = vsub.f32 %v787_v37, %v788_v39 }
 0x1e3   : > { %v790_v42 = vand.u32 4294901760, %v789_v40 }
 0x1e5   : > { %1349 = vmatmul.mubr.f32.vlgmr.msra.gmra.mrb[0].mxu1 %v790_v42 }
 0x1e6   : > { %1352 = vmatpush3.msra.mxu1 %v801_v41  ;;  %1353 = vmatprep.mubr.msk.f32.mxu1 %vm1552_vm1, %v1551_v8 }
 0x1e7   : > { %1356 = vmatprep.subr.mxu1 %v1551_v8 }
 0x1ed   : > { %1354 = vmatmul.mubr.f32.vlgmr.msra.gmra.mrb[0].mxu1 %v786_v36 }
 0x1ee   : > { %1357 = vmatpush3.msra.mxu1 %v798_v32  ;;  %1358 = vmatprep.mubr.msk.f32.mxu1 %vm1552_vm1, %v1551_v8 }
 0x1ef   : > { %1361 = vmatprep.subr.mxu1 %v1551_v8 }
 0x1f5   : > { %1359 = vmatmul.mubr.f32.vlgmr.msra.gmra.mrb[0].mxu1 %v787_v37 }
 0x1f6   : > { %1362 = vmatpush3.msra.mxu1 %v721_v27  ;;  %1363 = vmatprep.mubr.msk.f32.mxu1 %vm1552_vm1, %v1551_v8 }
 0x1f7   : > { %1366 = vmatprep.subr.mxu1 %v1551_v8 }
 0x1fd   : > { %1364 = vmatmul.mubr.f32.vlgmr.msra.gmra.mrb[0].mxu1 %v788_v39 }
 0x1fe   : > { %1367 = vmatpush3.msra.mxu1 %v799_v35  ;;  %1368 = vmatprep.mubr.msk.f32.mxu1 %vm1552_vm1, %v1551_v8 }
 0x1ff   : > { %1371 = vmatprep.subr.mxu1 %v1551_v8 }
 0x205   : > { %1369 = vmatmul.mubr.f32.vlgmr.msra.gmra.mrb[0].mxu1 %v786_v36 }
 0x206   : > { %1372 = vmatpush3.msra.mxu1 %v721_v27  ;;  %1373 = vmatprep.mubr.msk.f32.mxu1 %vm1552_vm1, %v1551_v8 }
 0x20d   : > { %1374 = vmatmul.mubr.f32.vlgmr.msra.gmra.mrb[0].mxu1 %v786_v36 }
 0x2e0   : > { %v1162_v44 = vpop.f32.mrb[0].mxu1 }
 0x2e1   : > { %v1377_v45 = vadd.f32 %v1162_v44, %v715_v43  ;;  %v1375_v46 = vpop.f32.mrb[1].mxu1 }
 0x2e3   : > { %v1284_v47 = vmul.f32 -1.442695, %v1377_v45 }
 0x2e5   : > { %1448 = vpow2.f32 %v1284_v47 }
 0x2ef   : > { %v1449_v48 = vpop.eup %1448 }
 0x2f0   : > { %v1169_v49 = vadd.f32 1.0, %v1449_v48 }
 0x2f2   : > { %1450 = vrcp.f32 %v1169_v49 }
 0x2fc   : > { %v1451_v51 = vpop.eup %1450 }
 0x2fd   : > { %v1175_v52 = vrot.slane %v1451_v51, %v1174_v50 }
 0x2ff   : > { %1177 = vbcast.lane.b32.xlu0 %v1175_v52, 256 }
 0x371   : > { %v1178_v57 = vpop.permute.xlu0 %1177 }
 0x372   : > { %v1186_v58 = vrot.slane %v1178_v57, %v1185_v56 }
 0x374   : > { %v1188_v59 = vmul.f32 %v1186_v58, %v1700_v0 }
 0x376   : > { %1189 = vst [vmem:[%s240_s9] sm:$0xff] %v1188_v59 }
 0x377   : > { %1495 = shalt.err (!%p1492_p4)
}
 0x378   : > { %s1496_s13 = scalar_lea.hbm %s1765_s15, 128  ;;  %s1500_s26 = scalar_lea.hbm %s1814_s5, 256 }
 0x379   : > { %p1497_p5 = scmp.ne.s32.totalorder %s1765_s15, %s1496_s13  ;;  %p1501_p0 = scmp.lt.u32.totalorder %s1765_s15, %s1814_s5 }
 0x37a   : > { %p1502_p1 = scmp.lt.u32.totalorder %s1500_s26, %s1496_s13  ;;  %p1504_p6 = scmp.lt.u32.totalorder %s1496_s13, %s1765_s15 }
 0x37b   : > { %p1498_p8 = pnand %p1497_p5, %p1823_p11 }
 0x37c   : > { %p1503_p3 = por %p1502_p1, %p1501_p0 }
 0x37d   : > { %p1499_p9 = pneg %p1498_p8 }
 0x37e   : > { %p1505_p12 = por %p1504_p6, %p1503_p3 }
 0x380   : > { %p1506_p13 = pnand %p1505_p12, %p1499_p9 }
 0x382   : > { %1509 = shalt.err (!%p1506_p13)
}
 0x383   : > { %1400 = dma.vmem_to_hbm [thread:$0]  (%p1823_p11), %s1767_s10, 128, %s1765_s15, %s1191_s12  }
 0x384 PF: > { %s1217_s7 = sand.u32 1, %s1536_s18   ;;  %p1824_p7 = scmp.ne.s32.totalorder %s1819_s6, 0 }
 0x385   : > { %p1825_p10 = scmp.ge.s32.totalorder %s1548_s21, 2  ;;  %s1218_s9 = scalar_lea.sflag [#allocation4], %s1217_s7 }
 0x387   : > { %p1407_p2 = pnand %p1825_p10, %p1824_p7 }
 0x389   : > { %1531 = dma.done.wait (!%p1407_p2), %s1218_s9, 128  }
 0x38a   : > { %1533 = vsyncadd (!%p1407_p2), %s1218_s9, 4294967168  ;;  %p18_p4 = scmp.ge.s32.totalorder %s1610_s24, 4   ;;  %s1826_s18 = smov %s1540_s19 }
 0x38b   : > { %s1827_s19 = smov %s1544_s20  ;;  %s1828_s20 = smov %s1622_s27 }
 0x38c   : > { %s1829_s21 = smov %s1610_s24  ;;  %20 = sbr.rel (!%p18_p4) target bundleno = 5 (0x5), region = 85 }
 0x393   :  { %1223 = vsyncpa [#allocation3], 1 }
 0x394   :  { %1225 = vsyncpa [#allocation3 + $0x1], 1 }
 0x395   :  { %1226 = vsyncpa [#allocation4], 1 }
 0x396   :  { %1228 = vsyncpa [#allocation4 + $0x1], 1 }

</bundles_post_ra>
